<compile_context>
chip_gen: v6e
topology: v6e:2x2x1
jax: 0.10.0
libtpu: 0.0.40
codegen_flags: <defaults>
</compile_context>

<pallas_src>
import jax
import jax.numpy as jnp
import numpy as np
from jax.experimental import pallas as pl
from jax.experimental.pallas import tpu as pltpu


def _softmax_loss_kernel(first_ignore_ref, emit_ref, tgt_ref, out_ref, acc_ref):
    b = pl.program_id(0)
    i = pl.program_id(1)
    ts = emit_ref.shape[0]            # tokens per tile (static)
    num_k = tgt_ref.shape[1]          # answers per token (static, small)

    @pl.when(jnp.logical_and(b == 0, i == 0))
    def _init():
        acc_ref[...] = jnp.zeros_like(acc_ref)

    fi = first_ignore_ref[b]          # break position for this batch (SMEM scalar)
    tile_start = i * ts

    # Skip tiles whose tokens are all at/after the break point: no EUP/VALU work.
    @pl.when(tile_start < fi)
    def _compute():
        emit = emit_ref[...].astype(jnp.float32)             # [TS, Lp]
        tgt = tgt_ref[...]                                   # [TS, K] int32

        m = jnp.max(emit, axis=-1, keepdims=True)            # [TS, 1]
        score = jnp.exp(emit - m)                            # [TS, Lp]
        sum_all = jnp.sum(score, axis=-1, keepdims=True)     # [TS, 1]

        # Fused masked gather of answer scores (duplicate indices are counted,
        # matching torch's score[answer].sum()). No one-hot array materialized.
        lab_iota = jax.lax.broadcasted_iota(jnp.int32, emit.shape, 1)
        sum_true = jnp.zeros_like(sum_all)
        for k in range(num_k):                               # static unroll
            mask_k = lab_iota == tgt[:, k:k + 1]
            sum_true = sum_true + jnp.sum(
                jnp.where(mask_k, score, 0.0), axis=-1, keepdims=True)

        tok_idx = jax.lax.broadcasted_iota(jnp.int32, (ts, 1), 0) + tile_start
        valid = tok_idx < fi                                 # [TS, 1]
        sum_all = jnp.where(valid, sum_all, 1.0)
        sum_true = jnp.where(valid, sum_true, 1.0)
        acc_ref[...] += jnp.log(sum_all) - jnp.log(sum_true)

    @pl.when(jnp.logical_and(b == pl.num_programs(0) - 1,
                             i == pl.num_programs(1) - 1))
    def _finalize():
        out_ref[...] = jnp.sum(acc_ref[...]).reshape(1, 1)


def _round_up(x, m):
    return (x + m - 1) // m * m


def _choose_token_tile(seq_len, lp):
    # Keep one emit tile <= ~2 MiB so the double-buffered pipeline stays well
    # under every generation's scoped-VMEM default (v5e 16 MiB, v6e/v7x 32 MiB).
    budget_bytes = 2 * 1024 * 1024
    ts = max(8, min(512, budget_bytes // (lp * 4)))
    ts = max(8, (ts // 8) * 8)
    ts = min(ts, _round_up(seq_len, 8))
    return ts


def softmax_layer_loss(emit, target, ignore_index):
    """Pallas implementation of SoftMaxlayer.forward. Returns a scalar float32."""
    B, S, L = emit.shape
    K = target.shape[-1]

    # Per-batch break position: first token whose answer set holds ignore_index.
    # Tiny O(B*S*K) reduce done in plain jnp, scalar-prefetched into SMEM.
    is_ignore = jnp.any(target == ignore_index, axis=-1)               # [B, S]
    seq_iota = jnp.arange(S, dtype=jnp.int32)[None, :]
    first_ignore = jnp.min(
        jnp.where(is_ignore, seq_iota, jnp.int32(S)), axis=-1).astype(jnp.int32)

    # Lane-dense label axis: pad L to a multiple of 128 with -1e30 (exp -> 0).
    Lp = _round_up(max(L, 1), 128)
    ts = _choose_token_tile(S, Lp)
    Sp = _round_up(S, ts)

    emit_p = emit
    if Sp > S:
        emit_p = jnp.pad(emit_p, ((0, 0), (0, Sp - S), (0, 0)))
    if Lp > L:
        emit_p = jnp.pad(emit_p, ((0, 0), (0, 0), (0, Lp - L)),
                         constant_values=-1e30)
    target_p = target.astype(jnp.int32)
    if Sp > S:
        target_p = jnp.pad(target_p, ((0, 0), (0, Sp - S), (0, 0)))

    num_tiles = Sp // ts
    grid_spec = pltpu.PrefetchScalarGridSpec(
        num_scalar_prefetch=1,
        grid=(B, num_tiles),
        in_specs=[
            pl.BlockSpec((None, ts, Lp), lambda b, i, fi: (b, i, 0)),
            pl.BlockSpec((None, ts, K), lambda b, i, fi: (b, i, 0)),
        ],
        out_specs=pl.BlockSpec((1, 1), lambda b, i, fi: (0, 0)),
        scratch_shapes=[pltpu.VMEM((ts, 1), jnp.float32)],
    )
    out = pl.pallas_call(
        _softmax_loss_kernel,
        out_shape=jax.ShapeDtypeStruct((1, 1), jnp.float32),
        grid_spec=grid_spec,
        compiler_params=pltpu.CompilerParams(
            # Serial accumulation across the grid -> "arbitrary" on both axes.
            dimension_semantics=("arbitrary", "arbitrary"),
            vmem_limit_bytes=32 * 1024 * 1024,
        ),
    )(first_ignore, emit_p, target_p)
    return out[0, 0]


def _reference_loss(emit, target, ignore_index):
    """Direct numpy transcription of the PyTorch forward loop."""
    loss = 0.0
    for b in range(emit.shape[0]):
        for s in range(emit.shape[1]):
            answer = target[b, s]
            if ignore_index in answer:
                break
            sc = emit[b, s].astype(np.float64)
            e = np.exp(sc - sc.max())
            loss += np.log(e.sum()) - np.log(e[answer].sum())
    return loss


if __name__ == "__main__":
    B, S, L, K = 2, 8, 32, 1
    IGNORE_INDEX = -1

    key = jax.random.PRNGKey(0)
    k_emit, k_tgt = jax.random.split(key)

    emit = jax.random.normal(k_emit, (B, S, L), dtype=jnp.float32)
    target = jax.random.randint(k_tgt, (B, S, K), 0, L, dtype=jnp.int32)
    # Mark the tail of batch 1 as padding -> the forward "break"s at position 5.
    target = target.at[1, 5:, :].set(IGNORE_INDEX)

    loss = softmax_layer_loss(emit, target, IGNORE_INDEX)
    loss = jax.block_until_ready(loss)

    ref = _reference_loss(np.asarray(emit), np.asarray(target), IGNORE_INDEX)
    np.testing.assert_allclose(np.asarray(loss), ref, rtol=1e-5, atol=1e-5)

    print("KERNEL_OK")
</pallas_src>

<mosaic_0001>
module attributes {stable_mosaic.version = 11 : i64} {
  func.func @_softmax_loss_kernel(%arg0: i32, %arg1: i32, %arg2: memref<2xi32, #tpu.memory_space<smem>>, %arg3: memref<1x8x128xf32, #tpu.memory_space<vmem>>, %arg4: memref<1x8x1xi32, #tpu.memory_space<vmem>>, %arg5: memref<1x1xf32, #tpu.memory_space<vmem>>, %arg6: memref<8x1xf32, #tpu.memory_space<vmem>>) attributes {dimension_semantics = [#tpu.dimension_semantics<arbitrary>, #tpu.dimension_semantics<arbitrary>], iteration_bounds = array<i64: 2, 1>, scalar_prefetch = 1 : i64, scratch_operands = 1 : i64, tpu.core_type = #tpu.core_type<tc>, window_params = [{transform_indices = @transform_0, window_bounds = array<i64: 1, 8, 128>}, {transform_indices = @transform_1, window_bounds = array<i64: 1, 8, 1>}, {pipeline_mode = #tpu.pipeline_mode<synchronous>, transform_indices = @transform_2, window_bounds = array<i64: 1, 1>}]} {
    %c0_i32 = arith.constant 0 : i32
    %0 = arith.cmpi eq, %arg0, %c0_i32 : i32
    %c0_i32_0 = arith.constant 0 : i32
    %1 = arith.cmpi eq, %arg1, %c0_i32_0 : i32
    %2 = arith.andi %0, %1 : i1
    %3 = arith.extui %2 : i1 to i32
    %c0_i32_1 = arith.constant 0 : i32
    %4 = arith.cmpi ne, %3, %c0_i32_1 : i32
    scf.if %4 {
      %cst = arith.constant 0.000000e+00 : f32
      %16 = vector.broadcast %cst : f32 to vector<8x1xf32>
      %c0 = arith.constant 0 : index
      %c0_5 = arith.constant 0 : index
      %17 = vector.load %arg6[%c0, %c0_5] : memref<8x1xf32, #tpu.memory_space<vmem>>, vector<8x1xf32>
      tpu.vector_store %arg6[%c0, %c0_5], %16 {strides = array<i32>} : memref<8x1xf32, #tpu.memory_space<vmem>>, vector<8x1xf32>,
    } else {
    }
    %5 = arith.index_cast %arg0 : i32 to index
    %6 = memref.load %arg2[%5] : memref<2xi32, #tpu.memory_space<smem>>
    %c8_i32 = arith.constant 8 : i32
    %7 = arith.muli %arg1, %c8_i32 : i32
    %8 = arith.cmpi slt, %7, %6 : i32
    %9 = arith.extui %8 : i1 to i32
    %c0_i32_2 = arith.constant 0 : i32
    %10 = arith.cmpi ne, %9, %c0_i32_2 : i32
    scf.if %10 {
      %c0 = arith.constant 0 : index
      %c0_5 = arith.constant 0 : index
      %c0_6 = arith.constant 0 : index
      %16 = vector.load %arg3[%c0, %c0_5, %c0_6] : memref<1x8x128xf32, #tpu.memory_space<vmem>>, vector<1x8x128xf32>
      %17 = vector.shape_cast %16 : vector<1x8x128xf32> to vector<8x128xf32>
      %c0_7 = arith.constant 0 : index
      %c0_8 = arith.constant 0 : index
      %c0_9 = arith.constant 0 : index
      %18 = vector.load %arg4[%c0_7, %c0_8, %c0_9] : memref<1x8x1xi32, #tpu.memory_space<vmem>>, vector<1x8x1xi32>
      %19 = vector.shape_cast %18 : vector<1x8x1xi32> to vector<8x1xi32>
      %cst = arith.constant dense<0xFF800000> : vector<8xf32>
      %20 = vector.multi_reduction <maximumf>, %17, %cst [1] : vector<8x128xf32> to vector<8xf32>
      %21 = vector.shape_cast %20 : vector<8xf32> to vector<8x1xf32>
      %22 = vector.broadcast %21 : vector<8x1xf32> to vector<8x128xf32>
      %23 = arith.subf %17, %22 : vector<8x128xf32>
      %24 = math.exp %23 : vector<8x128xf32>
      %cst_10 = arith.constant dense<0.000000e+00> : vector<8xf32>
      %25 = vector.multi_reduction <add>, %24, %cst_10 [1] : vector<8x128xf32> to vector<8xf32>
      %26 = vector.shape_cast %25 : vector<8xf32> to vector<8x1xf32>
      %27 = tpu.iota {dimensions = array<i32: 1>} : vector<8x128xi32>
      %cst_11 = arith.constant 0.000000e+00 : f32
      %28 = vector.broadcast %cst_11 : f32 to vector<8x1xf32>
      %29 = vector.broadcast %19 : vector<8x1xi32> to vector<8x128xi32>
      %30 = arith.cmpi eq, %27, %29 : vector<8x128xi32>
      %cst_12 = arith.constant 0.000000e+00 : f32
      %31 = vector.broadcast %cst_12 : f32 to vector<8x128xf32>
      %32 = arith.select %30, %24, %31 : vector<8x128xi1>, vector<8x128xf32>
      %cst_13 = arith.constant dense<0.000000e+00> : vector<8xf32>
      %33 = vector.multi_reduction <add>, %32, %cst_13 [1] : vector<8x128xf32> to vector<8xf32>
      %34 = vector.shape_cast %33 : vector<8xf32> to vector<8x1xf32>
      %35 = arith.addf %28, %34 : vector<8x1xf32>
      %36 = tpu.iota {dimensions = array<i32: 0>} : vector<8x1xi32>
      %37 = vector.broadcast %7 : i32 to vector<8x1xi32>
      %38 = arith.addi %36, %37 : vector<8x1xi32>
      %39 = vector.broadcast %6 : i32 to vector<8x1xi32>
      %40 = arith.cmpi slt, %38, %39 : vector<8x1xi32>
      %cst_14 = arith.constant 1.000000e+00 : f32
      %41 = vector.broadcast %cst_14 : f32 to vector<8x1xf32>
      %42 = arith.select %40, %26, %41 : vector<8x1xi1>, vector<8x1xf32>
      %cst_15 = arith.constant 1.000000e+00 : f32
      %43 = vector.broadcast %cst_15 : f32 to vector<8x1xf32>
      %44 = arith.select %40, %35, %43 : vector<8x1xi1>, vector<8x1xf32>
      %c0_16 = arith.constant 0 : index
      %c0_17 = arith.constant 0 : index
      %45 = vector.load %arg6[%c0_16, %c0_17] : memref<8x1xf32, #tpu.memory_space<vmem>>, vector<8x1xf32>
      %46 = math.log %42 : vector<8x1xf32>
      %47 = math.log %44 : vector<8x1xf32>
      %48 = arith.subf %46, %47 : vector<8x1xf32>
      %49 = arith.addf %45, %48 : vector<8x1xf32>
      %c0_18 = arith.constant 0 : index
      %c0_19 = arith.constant 0 : index
      %50 = vector.load %arg6[%c0_18, %c0_19] : memref<8x1xf32, #tpu.memory_space<vmem>>, vector<8x1xf32>
      tpu.vector_store %arg6[%c0_18, %c0_19], %49 {strides = array<i32>} : memref<8x1xf32, #tpu.memory_space<vmem>>, vector<8x1xf32>,
    } else {
    }
    %c1_i32 = arith.constant 1 : i32
    %11 = arith.cmpi eq, %arg0, %c1_i32 : i32
    %c0_i32_3 = arith.constant 0 : i32
    %12 = arith.cmpi eq, %arg1, %c0_i32_3 : i32
    %13 = arith.andi %11, %12 : i1
    %14 = arith.extui %13 : i1 to i32
    %c0_i32_4 = arith.constant 0 : i32
    %15 = arith.cmpi ne, %14, %c0_i32_4 : i32
    scf.if %15 {
      %c0 = arith.constant 0 : index
      %c0_5 = arith.constant 0 : index
      %16 = vector.load %arg6[%c0, %c0_5] : memref<8x1xf32, #tpu.memory_space<vmem>>, vector<8x1xf32>
      %17 = vector.shape_cast %16 : vector<8x1xf32> to vector<1x8x1xf32>
      %cst = arith.constant dense<0.000000e+00> : vector<1xf32>
      %18 = vector.multi_reduction <add>, %17, %cst [1, 2] : vector<1x8x1xf32> to vector<1xf32>
      %19 = vector.shape_cast %18 : vector<1xf32> to vector<1x1x1xf32>
      %20 = vector.extract %19[0, 0, 0] : f32 from vector<1x1x1xf32>
      %21 = vector.broadcast %20 : f32 to vector<1x1xf32>
      %c0_6 = arith.constant 0 : index
      %c0_7 = arith.constant 0 : index
      %22 = vector.load %arg5[%c0_6, %c0_7] : memref<1x1xf32, #tpu.memory_space<vmem>>, vector<1x1xf32>
      tpu.vector_store %arg5[%c0_6, %c0_7], %21 {strides = array<i32>} : memref<1x1xf32, #tpu.memory_space<vmem>>, vector<1x1xf32>,
    } else {
    }
    return
  }
  func.func @transform_0(%arg0: i32, %arg1: i32, %arg2: memref<2xi32, #tpu.memory_space<smem>>) -> (i32, i32, i32) {
    %c0_i32 = arith.constant 0 : i32
    %c0_i32_0 = arith.constant 0 : i32
    return %arg0, %arg1, %c0_i32 : i32, i32, i32
  }
  func.func @transform_1(%arg0: i32, %arg1: i32, %arg2: memref<2xi32, #tpu.memory_space<smem>>) -> (i32, i32, i32) {
    %c0_i32 = arith.constant 0 : i32
    %c0_i32_0 = arith.constant 0 : i32
    return %arg0, %arg1, %c0_i32 : i32, i32, i32
  }
  func.func @transform_2(%arg0: i32, %arg1: i32, %arg2: memref<2xi32, #tpu.memory_space<smem>>) -> (i32, i32) {
    %c0_i32 = arith.constant 0 : i32
    %c0_i32_0 = arith.constant 0 : i32
    %c0_i32_1 = arith.constant 0 : i32
    return %c0_i32, %c0_i32_0 : i32, i32
  }
}

</mosaic_0001>

<bundles_post_ra>
// kernel: tpu_custom_call.1
= control target key start
LH: loop header
LB: loop body
LE: loop exit
PB: predicated region body
PF: predicated region fallthrough
CT: control target
= control target key end

     0   :  { %s538_s0 = inlined_call_operand.vmem [shape: s32[2], index: 0, kind: input, shape index: {}]   ;;  %s539_s1 = inlined_call_operand.vmem [shape: f32[2,8,128], index: 1, kind: input, shape index: {}]   ;;  %s540_s2 = inlined_call_operand.vmem [shape: s32[2,8,1], index: 2, kind: input, shape index: {}]   ;;  %s541_s3 = inlined_call_operand.hbm [shape: f32[1,1], index: 3, kind: output, shape index: {}]  }
   0x1   :  { %s8_s14 = sshll.u32 %s538_s0, 4  ;;  %s9_s14 = int_to_ptr.vmem [resolvable:$true] %s8_s14 }
   0x2   :  { %s387_s15 = scalar_lea.vmem %s9_s14, 16  ;;  %p392_p1 = scmp.lt.s32.totalorder %s9_s14, %s9_s14 }
   0x3   :  { %p388_p0 = scmp.ne.s32.totalorder %s9_s14, %s387_s15  ;;  %p393_p2 = scmp.lt.s32.totalorder %s387_s15, %s387_s15 }
   0x5   :  { %p394_p3 = por %p393_p2, %p392_p1 }
   0x7   :  { %p395_p4 = pnand %p394_p3, %p388_p0 }
   0x9   :  { %398 = shalt.err (!%p395_p4)  }
   0xa   :  { %s453_s16 = smov [#allocation4]  }
   0xb   :  { %11 = dma.vmem_to_smem %s9_s14, 16, %s453_s16, [#allocation3] }
   0xc   :  { %435 = dma.done.wait [#allocation3], 16 }
   0xd   :  { %436 = vsyncadd [#allocation3], 4294967280 }
   0xe   :  { %13 = sfence }
   0xf   :  { %14 = vsyncpa [#allocation6], 0  ;;  %s480_s17 = smov 0   ;;  %s482_s18 = smov 0  }
  0x10   :  { %s484_s19 = smov 0  }
  0x11 LB: > { %s328_s0 = sadd.s32 4294967295, %s451_s19   ;;  %s32_s20 = sadd.s32 1, %s447_s18  ;;  %s451_s19 = sphi %s484_s19, %s20_s19   ;;  %s447_s18 = sphi %s482_s18, %s544_s18   ;;  %s443_s17 = sphi %s480_s17, %s543_s17  }
  0x12   : > { %p34_p5 = scmp.ge.s32.totalorder %s32_s20, 2  ;;  %p331_p6 = scmp.ge.s32.totalorder %s451_s19, 1 }
  0x13   : > { %p145_p7 = scmp.lt.s32.totalorder %s451_s19, 3 }
  0x14   : > { %s546_s20 = smov (%p34_p5, %s32_s20), 0 }
  0x15   : > { %p146_p8 = pnand %p331_p6, %p145_p7 }
  0x16   : > { %p171_p9 = scmp.lt.s32.totalorder (!%p146_p8), %s443_s17, 1  ;;  %p185_p10 = scmp.eq.s32.totalorder (!%p146_p8), %s443_s17, 0 }
  0x17   : > { %149 = sbr.rel (%p146_p8) target bundleno = 593 (0x251), region = 28 }
  0x1c   : > { %s172_s21 = scalar_select %p171_p9, %s443_s17, 1  ;;  %vm191_vm0 = vcmask (%p185_p10), 7168   ;;  %v454_v0 = vmov (%p185_p10), 0.0  }
  0x1d   : > { %190 = sbr.rel (!%p185_p10) target bundleno = 34 (0x22), region = 32  ;;  %192 = vst.msk [vmem:[#allocation2] sm:$0xff] (%p185_p10), %vm191_vm0, %v454_v0 }
  0x1e   : > { %s332_s22 = sshll.u32 %s172_s21, 3 }
  0x1f   : > { %s177_s25 = scalar_lea.vmem %s539_s1, %s332_s22  ;;  %s184_s28 = scalar_lea.vmem %s540_s2, %s332_s22 }
  0x22 PF: > { %s193_s29 = sld [smem:[#allocation4 + %s443_s17]] }
  0x28   : > { %p336_p11 = scmp.le.s32.totalorder %s193_s29, 0 }
  0x2a   : > { %198 = sbr.rel (%p336_p11) target bundleno = 368 (0x170), region = 36 }
  0x2f   : > { %v199_v1 = vld [vmem:[%s177_s25] sm:$0xff]  ;;  %v455_v2 = vmov 0   ;;  %v208_v7 = vlaneseq  ;;  %v222_v13 = vstv %s193_s29  ;;  %vm233_vm3 = vcmask 7168  }
  0x30   : > { %201 = vmax.xlane.f32.xlu0 %v199_v1  ;;  %v200_v3 = vld [vmem:[%s184_s28] sm:$0xff] }
  0x31   : > { %380 = vset.pattern.permute.xlu0 %v455_v2  ;;  %v209_v8 = vand.u32 127, %v208_v7  ;;  %v219_v12 = vshrl.u32 %v208_v7, 7  ;;  %v226_v22 = vld [vmem:[#allocation2] sm:$0xff] }
  0x33   : > { %vm223_vm2 = vcmp.lt.s32.totalorder %v219_v12, %v222_v13 }
  0x46   : > { %211 = vperm.xlu0 %380, %v200_v3  }
  0xb9   : > { %v202_v4 = vpop.xlane.xlu0 %201 }
  0xba   : > { %v203_v5 = vsub.f32 %v199_v1, %v202_v4 }
  0xbc   : > { %v204_v6 = vmul.f32 1.442695, %v203_v5 }
  0xbe   : > { %381 = vpow2.f32 %v204_v6 }
  0xc1   : > { %v212_v9 = vpop.permute.xlu0 %211 }
  0xc2   : > { %vm213_vm1 = vcmp.eq.s32.totalorder %v209_v8, %v212_v9 }
  0xcb   : > { %v382_v10 = vpop.eup %381 }
  0xcc   : > { %206 = vadd.xlane.f32.xlu1 %v382_v10  ;;  %v214_v11 = vsel %vm213_vm1, %v382_v10, 0.0 }
  0xd0   : > { %215 = vadd.xlane.f32.xlu1 %v214_v11 }
 0x155   : > { %v207_v14 = vpop.xlane.xlu1 %206 }
 0x156   : > { %v224_v15 = vsel %vm223_vm2, %v207_v14, 1.0 }
 0x157   : > { %383 = vlog2.f32 %v224_v15 }
 0x159   : > { %v216_v16 = vpop.xlane.xlu1 %215 }
 0x15a   : > { %v225_v17 = vsel %vm223_vm2, %v216_v16, 1.0 }
 0x15b   : > { %385 = vlog2.f32 %v225_v17 }
 0x164   : > { %v384_v18 = vpop.eup %383 }
 0x165   : > { %v228_v20 = vmul.f32 0.6931472, %v384_v18 }
 0x168   : > { %v386_v19 = vpop.eup %385 }
 0x169   : > { %v230_v21 = vmul.f32 0.6931472, %v386_v19 }
 0x16b   : > { %v231_v23 = vsub.f32 %v228_v20, %v230_v21 }
 0x16d   : > { %v232_v24 = vadd.f32 %v231_v23, %v226_v22 }
 0x16f   : > { %234 = vst.msk [vmem:[#allocation2] sm:$0xff] %vm233_vm3, %v232_v24 }
 0x170 PF: > { %p235_p12 = scmp.eq.s32.totalorder %s443_s17, 1 }
 0x171   : > { %vm241_vm4 = vcmask (%p235_p12), 7168   ;;  %vm253_vm5 = vcmask (%p235_p12), 0  }
 0x172   : > { %239 = sbr.rel (!%p235_p12) target bundleno = 578 (0x242), region = 40 }
 0x176   : > { %v240_v25 = vld [vmem:[#allocation2] sm:$0xff] (%p235_p12) }
 0x177   : > { %v242_v26 = vsel %vm241_vm4, %v240_v25, 0.0 }
 0x178   : > { %243 = vadd.xlane.f32.xlu0 %v242_v26 }
 0x201   : > { %v244_v27 = vpop.xlane.xlu0 %243 }
 0x202   : > { %v245_v28 = vrot.slane %v244_v27, 4 }
 0x204   : > { %v246_v29 = vadd.f32 %v245_v28, %v244_v27 }
 0x206   : > { %v247_v30 = vrot.slane %v246_v29, 2 }
 0x208   : > { %v248_v31 = vadd.f32 %v247_v30, %v246_v29 }
 0x20a   : > { %v249_v32 = vrot.slane %v248_v31, 1 }
 0x20c   : > { %v250_v33 = vadd.f32 %v249_v32, %v248_v31 }
 0x20e   : > { %344 = vpush %v250_v33 }
 0x23f   : > { %s345_s30 = spop %344 }
 0x240   : > { %v252_v34 = vstv %s345_s30 }
 0x241   : > { %254 = vst.msk [vmem:[#allocation5] sm:$0x1] %vm253_vm5, %v252_v34 }
 0x242 PF: > { %p514_p13 = scmp.eq.s32.totalorder %s328_s0, 1  ;;  %s456_s5 = smov [#allocation5]  }
 0x243   : > { %s262_s6 = sshll.u32 %s456_s5, 4  ;;  %s263_s6 = int_to_ptr.vmem [resolvable:$true] %s262_s6 }
 0x244   : > { %s399_s7 = scalar_lea.vmem %s263_s6, 16  ;;  %s405_s8 = scalar_lea.vmem %s263_s6, 32 }
 0x245   : > { %p400_p0 = scmp.ne.s32.totalorder %s263_s6, %s399_s7  ;;  %p406_p3 = scmp.lt.s32.totalorder %s263_s6, %s263_s6 }
 0x246   : > { %p407_p4 = scmp.lt.s32.totalorder %s405_s8, %s399_s7 }
 0x247   : > { %p401_p1 = pnand %p400_p0, %p514_p13 }
 0x248   : > { %p408_p5 = por %p407_p4, %p406_p3 }
 0x249   : > { %p402_p2 = pneg %p401_p1 }
 0x24b   : > { %p409_p6 = pnand %p408_p5, %p402_p2 }
 0x24d   : > { %412 = shalt.err (!%p409_p6)
}
 0x24e   : > { %347 = dma.vmem_to_hbm [thread:$0]  (%p514_p13), %s263_s6, 16, %s541_s3, [#allocation6]  }
 0x24f   : > { %438 = dma.done.wait (%p514_p13), [#allocation6], 16  }
 0x250   : > { %440 = vsyncadd (%p514_p13), [#allocation6], 4294967280 }
 0x251 PF: > { %s20_s19 = sadd.s32 1, %s451_s19   ;;  %s543_s17 = smov %s447_s18 }
 0x252   : > { %p17_p7 = scmp.ge.s32.totalorder %s20_s19, 4   ;;  %s544_s18 = smov %s546_s20 }
 0x254   :  { %19 = sbr.rel (!%p17_p7) target bundleno = 17 (0x11), region = 70 }
 0x259   :  { %275 = vsyncpa [#allocation6], 1 }
 0x25a   :  { %277 = vsyncpa [#allocation6 + $0x1], 1 }

</bundles_post_ra>
